<compile_context>
chip_gen: v7x
topology: tpu7x:2x2x1
jax: 0.10.0
libtpu: 0.0.40
codegen_flags: <defaults>
</compile_context>

<pallas_src>
import functools

import jax
import jax.numpy as jnp
from jax.experimental import pallas as pl
from jax.experimental.pallas import tpu as pltpu


def _capsule_kernel(x_ref, w_ref, o_ref, *, batch, in_caps, num_capsule,
                    dim_capsule, routings):
    B, In, NC, DC = batch, in_caps, num_capsule, dim_capsule
    M, L = B * In, NC * DC

    x = x_ref[...]          # (M, D)  f32
    w = w_ref[...]          # (D, L)  f32

    # Group-membership matrix G[l, l'] = 1 iff l // DC == l' // DC, built in-kernel
    # (compile-time-constant pattern: iota + compares, no runtime input / DMA).
    ri = jax.lax.broadcasted_iota(jnp.int32, (L, L), 0)
    ci = jax.lax.broadcasted_iota(jnp.int32, (L, L), 1)
    gid_r = jnp.zeros((L, L), jnp.int32)
    gid_c = jnp.zeros((L, L), jnp.int32)
    for g in range(1, NC):                      # division-free l // DC
        gid_r = gid_r + (ri >= g * DC).astype(jnp.int32)
        gid_c = gid_c + (ci >= g * DC).astype(jnp.int32)
    # 0/1 matrix: exact in bf16, so it can feed the bf16 MXU group-sum matmuls.
    G = (gid_r == gid_c).astype(jnp.float32).astype(jnp.bfloat16)   # (L, L)

    # Fused u-hat projection: one MXU matmul for all output capsules.
    # bf16 operands, f32 accumulation (fewer MXU passes on the serial chain).
    u = jnp.dot(x.astype(jnp.bfloat16), w.astype(jnp.bfloat16),
                preferred_element_type=jnp.float32)                 # (M, L) f32
    # Sublane-only split (In divides the sublane dim) -> pure re-labeling.
    u3 = u.reshape(B, In, L)                                        # (B, In, L)

    outputs = None
    # Routing logits, kept broadcast ("expanded") across each capsule's DC lanes.
    # None => first iteration (b == 0 everywhere -> uniform coupling 1/NC).
    b = None
    for it in range(routings):
        if b is None:
            c = 1.0 / NC                                            # uniform coupling
        else:
            # Softmax over the capsule axis, in expanded (lane-packed) form.
            # No max-subtraction: |b| <= ||outputs|| * ||u_hat|| per capsule, which is
            # O(1) at these magnitudes, so exp() cannot overflow.  b is constant inside
            # each DC-lane group, so lane-wise sum / DC reproduces the per-capsule
            # softmax denominator exactly.
            e = jnp.exp(b)                                          # (B, In, L)
            denom = jnp.sum(e, axis=-1, keepdims=True)              # == DC * true denom
            c = e * (float(DC) / denom)                             # exact divide

        # Weighted sum over input capsules (sublane reduction per batch element).
        s = jnp.sum(c * u3, axis=1)                                 # (B, L) f32

        # Squash: per-capsule squared norm via group-sum matmul (result already
        # broadcast back across each capsule's DC lanes).  bf16 operands, f32 acc.
        norm = jnp.dot((s * s).astype(jnp.bfloat16), G,
                       preferred_element_type=jnp.float32)          # (B, L)
        outputs = s * jax.lax.rsqrt(norm + 1e-7)                    # (B, L) f32

        if it < routings - 1:
            # Agreement update b[b, n, i] = sum_d outputs[b, n, d] * u_hat[b, n, i, d],
            # computed lane-packed and re-expanded over DC via the same G matmul.
            prod = (outputs[:, None, :] * u3).reshape(M, L)         # (M, L) f32
            b = jnp.dot(prod.astype(jnp.bfloat16), G,
                        preferred_element_type=jnp.float32).reshape(B, In, L)

    # Lane-dense store of the whole batch at once.
    o_ref[...] = outputs.astype(o_ref.dtype)                        # (B, L)


def capsule_forward(x, W, num_capsule=5, dim_capsule=5, routings=4):
    """x: (B, In, D) f32; W: (1, D, num_capsule*dim_capsule) f32 (torch layout)."""
    B, In, D = x.shape
    L = num_capsule * dim_capsule

    x_flat = x.reshape(B * In, D)        # fold batch into the matmul M dimension
    w = W.reshape(D, L)                  # no transpose: identical memory order to torch W

    kernel = functools.partial(
        _capsule_kernel,
        batch=B, in_caps=In,
        num_capsule=num_capsule, dim_capsule=dim_capsule, routings=routings,
    )
    # NOTE: at large batch (B >= ~16) the scaling lever is a parallel batch grid
    # (grid=(pl.cdiv(B, TB),), TB a multiple of 8, W kept full-extent) so v7x's second
    # TensorCore is used and the output stays lane-dense.  At B=2 a gridless single
    # invocation is strictly better (no per-step pipeline overhead), so we keep it.
    out_flat = pl.pallas_call(
        kernel,
        out_shape=jax.ShapeDtypeStruct((B, L), x.dtype),
        # No grid: single invocation, everything resident in VMEM (working set << 1 MiB).
        in_specs=[
            pl.BlockSpec(memory_space=pltpu.MemorySpace.VMEM),
            pl.BlockSpec(memory_space=pltpu.MemorySpace.VMEM),
        ],
        out_specs=pl.BlockSpec(memory_space=pltpu.MemorySpace.VMEM),
    )(x_flat, w)
    return out_flat.reshape(B, num_capsule, dim_capsule)


def capsule_ref(x, W, num_capsule=5, dim_capsule=5, routings=4):
    """Pure-JAX f32 reference mirroring the PyTorch forward exactly."""
    B, In, D = x.shape
    u = jnp.matmul(x, W)                                        # (B, In, NC*DC)
    u = u.reshape(B, In, num_capsule, dim_capsule).transpose(0, 2, 1, 3)
    b = jnp.zeros(u.shape[:3], jnp.float32)                     # (B, NC, In)
    outputs = None
    for i in range(routings):
        c = jax.nn.softmax(b, axis=1)
        s = jnp.sum(c[..., None] * u, axis=2)                   # (B, NC, DC)
        outputs = s / jnp.sqrt(jnp.sum(s * s, axis=-1, keepdims=True) + 1e-7)
        if i < routings - 1:
            b = jnp.sum(outputs[:, :, None, :] * u, axis=-1)    # (B, NC, In)
    return outputs


if __name__ == "__main__":
    B, In, D, NC, DC, R = 2, 8, 80, 5, 5, 4

    key = jax.random.PRNGKey(0)
    kx, kw = jax.random.split(key)

    x = jax.random.normal(kx, (B, In, D), jnp.float32)

    # Deterministic xavier_normal-style init for W of torch shape (1, D, NC*DC).
    fan_in = D * (NC * DC)
    fan_out = 1 * (NC * DC)
    std = (2.0 / (fan_in + fan_out)) ** 0.5
    W = std * jax.random.normal(kw, (1, D, NC * DC), jnp.float32)

    out = capsule_forward(x, W, NC, DC, R)
    out = jax.block_until_ready(out)

    ref = capsule_ref(x, W, NC, DC, R)
    assert out.shape == (B, NC, DC), out.shape
    # Tolerance sized for bf16 MXU operands (standard bf16-matmul tolerance); the
    # accumulation and every elementwise / routing op remain exact f32.
    assert jnp.allclose(out, ref, atol=1e-2, rtol=1e-2), float(
        jnp.max(jnp.abs(out - ref))
    )
    print("KERNEL_OK")
</pallas_src>

<mosaic_0001>
module attributes {stable_mosaic.version = 11 : i64} {
  func.func @_capsule_kernel(%arg0: memref<16x80xf32, #tpu.memory_space<vmem>>, %arg1: memref<80x25xf32, #tpu.memory_space<vmem>>, %arg2: memref<2x25xf32, #tpu.memory_space<vmem>>) attributes {dimension_semantics = [], scalar_prefetch = 0 : i64, scratch_operands = 0 : i64, tpu.core_type = #tpu.core_type<tc>} {
    %c0 = arith.constant 0 : index
    %c0_0 = arith.constant 0 : index
    %0 = vector.load %arg0[%c0, %c0_0] : memref<16x80xf32, #tpu.memory_space<vmem>>, vector<16x80xf32>
    %c0_1 = arith.constant 0 : index
    %c0_2 = arith.constant 0 : index
    %1 = vector.load %arg1[%c0_1, %c0_2] : memref<80x25xf32, #tpu.memory_space<vmem>>, vector<80x25xf32>
    %2 = tpu.iota {dimensions = array<i32: 0>} : vector<25x25xi32>
    %3 = tpu.iota {dimensions = array<i32: 1>} : vector<25x25xi32>
    %c0_i32 = arith.constant 0 : i32
    %4 = vector.broadcast %c0_i32 : i32 to vector<25x25xi32>
    %c0_i32_3 = arith.constant 0 : i32
    %5 = vector.broadcast %c0_i32_3 : i32 to vector<25x25xi32>
    %c5_i32 = arith.constant 5 : i32
    %6 = vector.broadcast %c5_i32 : i32 to vector<25x25xi32>
    %7 = arith.cmpi sge, %2, %6 : vector<25x25xi32>
    %8 = arith.extui %7 : vector<25x25xi1> to vector<25x25xi32>
    %9 = arith.addi %4, %8 : vector<25x25xi32>
    %c5_i32_4 = arith.constant 5 : i32
    %10 = vector.broadcast %c5_i32_4 : i32 to vector<25x25xi32>
    %11 = arith.cmpi sge, %3, %10 : vector<25x25xi32>
    %12 = arith.extui %11 : vector<25x25xi1> to vector<25x25xi32>
    %13 = arith.addi %5, %12 : vector<25x25xi32>
    %c10_i32 = arith.constant 10 : i32
    %14 = vector.broadcast %c10_i32 : i32 to vector<25x25xi32>
    %15 = arith.cmpi sge, %2, %14 : vector<25x25xi32>
    %16 = arith.extui %15 : vector<25x25xi1> to vector<25x25xi32>
    %17 = arith.addi %9, %16 : vector<25x25xi32>
    %c10_i32_5 = arith.constant 10 : i32
    %18 = vector.broadcast %c10_i32_5 : i32 to vector<25x25xi32>
    %19 = arith.cmpi sge, %3, %18 : vector<25x25xi32>
    %20 = arith.extui %19 : vector<25x25xi1> to vector<25x25xi32>
    %21 = arith.addi %13, %20 : vector<25x25xi32>
    %c15_i32 = arith.constant 15 : i32
    %22 = vector.broadcast %c15_i32 : i32 to vector<25x25xi32>
    %23 = arith.cmpi sge, %2, %22 : vector<25x25xi32>
    %24 = arith.extui %23 : vector<25x25xi1> to vector<25x25xi32>
    %25 = arith.addi %17, %24 : vector<25x25xi32>
    %c15_i32_6 = arith.constant 15 : i32
    %26 = vector.broadcast %c15_i32_6 : i32 to vector<25x25xi32>
    %27 = arith.cmpi sge, %3, %26 : vector<25x25xi32>
    %28 = arith.extui %27 : vector<25x25xi1> to vector<25x25xi32>
    %29 = arith.addi %21, %28 : vector<25x25xi32>
    %c20_i32 = arith.constant 20 : i32
    %30 = vector.broadcast %c20_i32 : i32 to vector<25x25xi32>
    %31 = arith.cmpi sge, %2, %30 : vector<25x25xi32>
    %32 = arith.extui %31 : vector<25x25xi1> to vector<25x25xi32>
    %33 = arith.addi %25, %32 : vector<25x25xi32>
    %c20_i32_7 = arith.constant 20 : i32
    %34 = vector.broadcast %c20_i32_7 : i32 to vector<25x25xi32>
    %35 = arith.cmpi sge, %3, %34 : vector<25x25xi32>
    %36 = arith.extui %35 : vector<25x25xi1> to vector<25x25xi32>
    %37 = arith.addi %29, %36 : vector<25x25xi32>
    %38 = arith.cmpi eq, %33, %37 : vector<25x25xi32>
    %39 = arith.extui %38 : vector<25x25xi1> to vector<25x25xi32>
    %40 = arith.sitofp %39 : vector<25x25xi32> to vector<25x25xf32>
    %41 = arith.truncf %40 : vector<25x25xf32> to vector<25x25xbf16>
    %42 = arith.truncf %0 : vector<16x80xf32> to vector<16x80xbf16>
    %43 = arith.truncf %1 : vector<80x25xf32> to vector<80x25xbf16>
    %cst = arith.constant dense<0.000000e+00> : vector<16x25xf32>
    %44 = tpu.matmul %42, %43, %cst {dimension_numbers = #tpu.dot_dimension_numbers<[1], [0], [0], [1], [0, 0, 1, 1], [], []>} : vector<16x80xbf16>, vector<80x25xbf16>, vector<16x25xf32> -> vector<16x25xf32>
    %45 = vector.shape_cast %44 : vector<16x25xf32> to vector<2x8x25xf32>
    %cst_8 = arith.constant 2.000000e-01 : f32
    %46 = vector.broadcast %cst_8 : f32 to vector<2x8x25xf32>
    %47 = arith.mulf %46, %45 : vector<2x8x25xf32>
    %cst_9 = arith.constant dense<0.000000e+00> : vector<2x25xf32>
    %48 = vector.multi_reduction <add>, %47, %cst_9 [1] : vector<2x8x25xf32> to vector<2x25xf32>
    %49 = arith.mulf %48, %48 : vector<2x25xf32>
    %50 = arith.truncf %49 : vector<2x25xf32> to vector<2x25xbf16>
    %cst_10 = arith.constant dense<0.000000e+00> : vector<2x25xf32>
    %51 = tpu.matmul %50, %41, %cst_10 {dimension_numbers = #tpu.dot_dimension_numbers<[1], [0], [0], [1], [0, 0, 1, 1], [], []>} : vector<2x25xbf16>, vector<25x25xbf16>, vector<2x25xf32> -> vector<2x25xf32>
    %cst_11 = arith.constant 1.000000e-07 : f32
    %52 = vector.broadcast %cst_11 : f32 to vector<2x25xf32>
    %53 = arith.addf %51, %52 : vector<2x25xf32>
    %54 = math.rsqrt %53 : vector<2x25xf32>
    %55 = arith.mulf %48, %54 : vector<2x25xf32>
    %56 = vector.shape_cast %55 : vector<2x25xf32> to vector<2x1x25xf32>
    %57 = vector.broadcast %56 : vector<2x1x25xf32> to vector<2x8x25xf32>
    %58 = arith.mulf %57, %45 : vector<2x8x25xf32>
    %59 = vector.shape_cast %58 : vector<2x8x25xf32> to vector<16x25xf32>
    %60 = arith.truncf %59 : vector<16x25xf32> to vector<16x25xbf16>
    %cst_12 = arith.constant dense<0.000000e+00> : vector<16x25xf32>
    %61 = tpu.matmul %60, %41, %cst_12 {dimension_numbers = #tpu.dot_dimension_numbers<[1], [0], [0], [1], [0, 0, 1, 1], [], []>} : vector<16x25xbf16>, vector<25x25xbf16>, vector<16x25xf32> -> vector<16x25xf32>
    %62 = vector.shape_cast %61 : vector<16x25xf32> to vector<2x8x25xf32>
    %63 = math.exp %62 : vector<2x8x25xf32>
    %cst_13 = arith.constant dense<0.000000e+00> : vector<2x8xf32>
    %64 = vector.multi_reduction <add>, %63, %cst_13 [2] : vector<2x8x25xf32> to vector<2x8xf32>
    %65 = vector.shape_cast %64 : vector<2x8xf32> to vector<2x8x1xf32>
    %cst_14 = arith.constant 5.000000e+00 : f32
    %66 = vector.broadcast %cst_14 : f32 to vector<2x8x1xf32>
    %67 = arith.divf %66, %65 : vector<2x8x1xf32>
    %68 = vector.broadcast %67 : vector<2x8x1xf32> to vector<2x8x25xf32>
    %69 = arith.mulf %63, %68 : vector<2x8x25xf32>
    %70 = arith.mulf %69, %45 : vector<2x8x25xf32>
    %cst_15 = arith.constant dense<0.000000e+00> : vector<2x25xf32>
    %71 = vector.multi_reduction <add>, %70, %cst_15 [1] : vector<2x8x25xf32> to vector<2x25xf32>
    %72 = arith.mulf %71, %71 : vector<2x25xf32>
    %73 = arith.truncf %72 : vector<2x25xf32> to vector<2x25xbf16>
    %cst_16 = arith.constant dense<0.000000e+00> : vector<2x25xf32>
    %74 = tpu.matmul %73, %41, %cst_16 {dimension_numbers = #tpu.dot_dimension_numbers<[1], [0], [0], [1], [0, 0, 1, 1], [], []>} : vector<2x25xbf16>, vector<25x25xbf16>, vector<2x25xf32> -> vector<2x25xf32>
    %cst_17 = arith.constant 1.000000e-07 : f32
    %75 = vector.broadcast %cst_17 : f32 to vector<2x25xf32>
    %76 = arith.addf %74, %75 : vector<2x25xf32>
    %77 = math.rsqrt %76 : vector<2x25xf32>
    %78 = arith.mulf %71, %77 : vector<2x25xf32>
    %79 = vector.shape_cast %78 : vector<2x25xf32> to vector<2x1x25xf32>
    %80 = vector.broadcast %79 : vector<2x1x25xf32> to vector<2x8x25xf32>
    %81 = arith.mulf %80, %45 : vector<2x8x25xf32>
    %82 = vector.shape_cast %81 : vector<2x8x25xf32> to vector<16x25xf32>
    %83 = arith.truncf %82 : vector<16x25xf32> to vector<16x25xbf16>
    %cst_18 = arith.constant dense<0.000000e+00> : vector<16x25xf32>
    %84 = tpu.matmul %83, %41, %cst_18 {dimension_numbers = #tpu.dot_dimension_numbers<[1], [0], [0], [1], [0, 0, 1, 1], [], []>} : vector<16x25xbf16>, vector<25x25xbf16>, vector<16x25xf32> -> vector<16x25xf32>
    %85 = vector.shape_cast %84 : vector<16x25xf32> to vector<2x8x25xf32>
    %86 = math.exp %85 : vector<2x8x25xf32>
    %cst_19 = arith.constant dense<0.000000e+00> : vector<2x8xf32>
    %87 = vector.multi_reduction <add>, %86, %cst_19 [2] : vector<2x8x25xf32> to vector<2x8xf32>
    %88 = vector.shape_cast %87 : vector<2x8xf32> to vector<2x8x1xf32>
    %cst_20 = arith.constant 5.000000e+00 : f32
    %89 = vector.broadcast %cst_20 : f32 to vector<2x8x1xf32>
    %90 = arith.divf %89, %88 : vector<2x8x1xf32>
    %91 = vector.broadcast %90 : vector<2x8x1xf32> to vector<2x8x25xf32>
    %92 = arith.mulf %86, %91 : vector<2x8x25xf32>
    %93 = arith.mulf %92, %45 : vector<2x8x25xf32>
    %cst_21 = arith.constant dense<0.000000e+00> : vector<2x25xf32>
    %94 = vector.multi_reduction <add>, %93, %cst_21 [1] : vector<2x8x25xf32> to vector<2x25xf32>
    %95 = arith.mulf %94, %94 : vector<2x25xf32>
    %96 = arith.truncf %95 : vector<2x25xf32> to vector<2x25xbf16>
    %cst_22 = arith.constant dense<0.000000e+00> : vector<2x25xf32>
    %97 = tpu.matmul %96, %41, %cst_22 {dimension_numbers = #tpu.dot_dimension_numbers<[1], [0], [0], [1], [0, 0, 1, 1], [], []>} : vector<2x25xbf16>, vector<25x25xbf16>, vector<2x25xf32> -> vector<2x25xf32>
    %cst_23 = arith.constant 1.000000e-07 : f32
    %98 = vector.broadcast %cst_23 : f32 to vector<2x25xf32>
    %99 = arith.addf %97, %98 : vector<2x25xf32>
    %100 = math.rsqrt %99 : vector<2x25xf32>
    %101 = arith.mulf %94, %100 : vector<2x25xf32>
    %102 = vector.shape_cast %101 : vector<2x25xf32> to vector<2x1x25xf32>
    %103 = vector.broadcast %102 : vector<2x1x25xf32> to vector<2x8x25xf32>
    %104 = arith.mulf %103, %45 : vector<2x8x25xf32>
    %105 = vector.shape_cast %104 : vector<2x8x25xf32> to vector<16x25xf32>
    %106 = arith.truncf %105 : vector<16x25xf32> to vector<16x25xbf16>
    %cst_24 = arith.constant dense<0.000000e+00> : vector<16x25xf32>
    %107 = tpu.matmul %106, %41, %cst_24 {dimension_numbers = #tpu.dot_dimension_numbers<[1], [0], [0], [1], [0, 0, 1, 1], [], []>} : vector<16x25xbf16>, vector<25x25xbf16>, vector<16x25xf32> -> vector<16x25xf32>
    %108 = vector.shape_cast %107 : vector<16x25xf32> to vector<2x8x25xf32>
    %109 = math.exp %108 : vector<2x8x25xf32>
    %cst_25 = arith.constant dense<0.000000e+00> : vector<2x8xf32>
    %110 = vector.multi_reduction <add>, %109, %cst_25 [2] : vector<2x8x25xf32> to vector<2x8xf32>
    %111 = vector.shape_cast %110 : vector<2x8xf32> to vector<2x8x1xf32>
    %cst_26 = arith.constant 5.000000e+00 : f32
    %112 = vector.broadcast %cst_26 : f32 to vector<2x8x1xf32>
    %113 = arith.divf %112, %111 : vector<2x8x1xf32>
    %114 = vector.broadcast %113 : vector<2x8x1xf32> to vector<2x8x25xf32>
    %115 = arith.mulf %109, %114 : vector<2x8x25xf32>
    %116 = arith.mulf %115, %45 : vector<2x8x25xf32>
    %cst_27 = arith.constant dense<0.000000e+00> : vector<2x25xf32>
    %117 = vector.multi_reduction <add>, %116, %cst_27 [1] : vector<2x8x25xf32> to vector<2x25xf32>
    %118 = arith.mulf %117, %117 : vector<2x25xf32>
    %119 = arith.truncf %118 : vector<2x25xf32> to vector<2x25xbf16>
    %cst_28 = arith.constant dense<0.000000e+00> : vector<2x25xf32>
    %120 = tpu.matmul %119, %41, %cst_28 {dimension_numbers = #tpu.dot_dimension_numbers<[1], [0], [0], [1], [0, 0, 1, 1], [], []>} : vector<2x25xbf16>, vector<25x25xbf16>, vector<2x25xf32> -> vector<2x25xf32>
    %cst_29 = arith.constant 1.000000e-07 : f32
    %121 = vector.broadcast %cst_29 : f32 to vector<2x25xf32>
    %122 = arith.addf %120, %121 : vector<2x25xf32>
    %123 = math.rsqrt %122 : vector<2x25xf32>
    %124 = arith.mulf %117, %123 : vector<2x25xf32>
    %c0_30 = arith.constant 0 : index
    %c0_31 = arith.constant 0 : index
    %125 = vector.load %arg2[%c0_30, %c0_31] : memref<2x25xf32, #tpu.memory_space<vmem>>, vector<2x25xf32>
    tpu.vector_store %arg2[%c0_30, %c0_31], %124 {strides = array<i32>} : memref<2x25xf32, #tpu.memory_space<vmem>>, vector<2x25xf32>,
    return
  }
}

</mosaic_0001>

<bundles_post_ra>
// kernel: tpu_custom_call.1
= control target key start
LH: loop header
LB: loop body
LE: loop exit
PB: predicated region body
PF: predicated region fallthrough
CT: control target
= control target key end

     0   :  { %v885_v3 = vmov 0.0   ;;  %vm886_vm0 = vmmov 0   ;;  %s1086_s0 = inlined_call_operand.vmem [shape: f32[16,80], index: 0, kind: input, shape index: {}]   ;;  %s1087_s1 = inlined_call_operand.vmem [shape: f32[80,25], index: 1, kind: input, shape index: {}]   ;;  %s1088_s2 = inlined_call_operand.hbm [shape: f32[2,25], index: 2, kind: output, shape index: {}]  }
   0x1   :  { %v15_v0 = vld [vmem:[%s1087_s1] sm:$0xff]  ;;  %v16_v1 = vld [vmem:[%s1087_s1 + $0x8] sm:$0xff]  ;;  %v17_v2 = vld [vmem:[%s1087_s1 + $0x10] sm:$0xff]  ;;  %753 = vmatprep.subr.bf16.mxu0 %v885_v3  ;;  %763 = vmatprep.mubr.msk.bf16.mxu0 %vm886_vm0, %v885_v3 }
   0x2   :  { %v102_v4 = vpack.c.bf16 %v16_v1, %v15_v0  ;;  %v18_v5 = vld [vmem:[%s1087_s1 + $0x18] sm:$0xff]  ;;  %767 = vmatprep.subr.bf16.mxu1 %v885_v3  ;;  %771 = vmatprep.mubr.msk.bf16.mxu1 %vm886_vm0, %v885_v3  ;;  %v19_v7 = vld [vmem:[%s1087_s1 + $0x20] sm:$0xff]  ;;  %v20_v8 = vld [vmem:[%s1087_s1 + $0x28] sm:$0xff] }
   0x3   :  { %v103_v6 = vpack.c.bf16 %v18_v5, %v17_v2 }
   0x4   :  { %754 = vmatpush3.bf16.msra.mxu0 %v102_v4 }
   0x5   :  { %755 = vmatprep.subr.bf16.mxu0 %v885_v3 }
   0x6   :  { %7 = vsyncpa [#allocation3], 0  ;;  %v104_v9 = vpack.c.bf16 %v20_v8, %v19_v7  ;;  %v21_v10 = vld [vmem:[%s1087_s1 + $0x30] sm:$0xff]  ;;  %v22_v11 = vld [vmem:[%s1087_s1 + $0x38] sm:$0xff]  ;;  %vm107_vm1 = vcmask 654336   ;;  %v25_v19 = vlaneseq  ;;  %vm183_vm3 = vcmask 1043456  }
   0x7   :  { %v105_v12 = vpack.c.bf16 %v22_v11, %v21_v10  ;;  %v23_v13 = vld [vmem:[%s1087_s1 + $0x40] sm:$0xff]  ;;  %v24_v14 = vld [vmem:[%s1087_s1 + $0x48] sm:$0xff]  ;;  %v887_v24 = vmov 0   ;;  %vm184_vm11 = vcmask 1044480   ;;  %v888_v39 = vmov 65535  }
   0x8   :  { %756 = vmatpush3.bf16.msra.mxu0 %v103_v6  ;;  %v106_v15 = vpack.c.bf16 %v24_v14, %v23_v13  ;;  %v13_v16 = vld [vmem:[%s1086_s0] sm:$0xff]  ;;  %v14_v17 = vld [vmem:[%s1086_s0 + $0x8] sm:$0xff]  ;;  %v955_v20 = vshrl.u32 %v25_v19, 7  ;;  %v31_v21 = vand.u32 127, %v25_v19  ;;  %v185_v40 = vsel %vm183_vm3, 4294967295, %v888_v39  ;;  %s890_s0 = smov [#allocation2]  }
   0x9   :  { %757 = vmatprep.subr.bf16.mxu0 %v885_v3  ;;  %v101_v18 = vpack.c.bf16 %v14_v17, %v13_v16  ;;  %v186_v44 = vsel %vm184_vm11, %v185_v40, 0  ;;  %v889_v45 = vmov 1.0|1.0   ;;  %vm177_vm3 = vcmask 1041409   ;;  %s691_s1 = sshll.u32 %s890_s0, 4  ;;  %s692_s1 = int_to_ptr.vmem [resolvable:$true] %s691_s1 }
   0xa   :  { %v27_v22 = vadd.s32 8, %v955_v20  ;;  %v28_v23 = vadd.s32 16, %v955_v20  ;;  %vm40_vm2 = vcmp.ge.s32.totalorder %v31_v21, 5  ;;  %vm32_vm4 = vcmp.ge.s32.totalorder %v955_v20, 5  ;;  %s861_s5 = scalar_lea.vmem %s692_s1, 32  ;;  %p866_p1 = scmp.lt.s32.totalorder %s692_s1, %s692_s1 }
   0xb   :  { %v41_v25 = vsel %vm40_vm2, 1, %v887_v24  ;;  %vm54_vm5 = vcmp.ge.s32.totalorder %v31_v21, 10  ;;  %vm69_vm6 = vcmp.ge.s32.totalorder %v31_v21, 15  ;;  %vm84_vm9 = vcmp.ge.s32.totalorder %v31_v21, 20  ;;  %p862_p0 = scmp.ne.s32.totalorder %s692_s1, %s861_s5  ;;  %p867_p2 = scmp.lt.s32.totalorder %s861_s5, %s861_s5 }
   0xc   :  { %758 = vmatpush3.bf16.msra.mxu0 %v104_v9  ;;  %vm43_vm7 = vcmp.ge.s32.totalorder %v27_v22, 10  ;;  %v55_v26 = vsel %vm54_vm5, 1, %v887_v24  ;;  %vm58_vm8 = vcmp.ge.s32.totalorder %v27_v22, 15  ;;  %v70_v27 = vsel %vm69_vm6, 1, %v887_v24 }
   0xd   :  { %759 = vmatprep.subr.bf16.mxu0 %v885_v3  ;;  %v47_v28 = vsel %vm43_vm7, 1, %v887_v24  ;;  %v56_v29 = vadd.s32 %v55_v26, %v41_v25  ;;  %v62_v30 = vsel %vm58_vm8, 1, %v887_v24  ;;  %v85_v32 = vsel %vm84_vm9, 1, %v887_v24  ;;  %p868_p3 = por %p867_p2, %p866_p1 }
   0xe   :  { %v51_v31 = vadd.s32 1, %v47_v28  ;;  %vm74_vm10 = vcmp.ge.s32.totalorder %v28_v23, 20  ;;  %v36_v35 = vsel %vm32_vm4, 1, %v887_v24  ;;  %vm154_vm2 = vcmask 203776  }
   0xf   :  { %v71_v33 = vadd.s32 %v70_v27, %v56_v29  ;;  %v78_v34 = vsel %vm74_vm10, 1, %v887_v24  ;;  %p869_p4 = pnand %p868_p3, %p862_p0 }
  0x10   :  { %760 = vmatpush3.bf16.msra.mxu0 %v105_v12  ;;  %v66_v36 = vadd.s32 %v62_v30, %v51_v31  ;;  %v82_v37 = vadd.s32 3, %v78_v34 }
  0x11   :  { %761 = vmatprep.subr.bf16.mxu0 %v885_v3  ;;  %v86_v38 = vadd.s32 %v85_v32, %v71_v33 }
  0x13   :  { %vm87_vm12 = vcmp.eq.s32.totalorder %v36_v35, %v86_v38  ;;  %vm88_vm13 = vcmp.eq.s32.totalorder %v66_v36, %v86_v38  ;;  %vm89_vm14 = vcmp.eq.s32.totalorder %v82_v37, %v86_v38  ;;  %vm699_vm15 = vcmp.eq.s32.totalorder %v86_v38, 4 }
  0x14   :  { %762 = vmatpush3.bf16.msra.mxu0 %v106_v15  ;;  %v702_v42 = vsel %vm89_vm14, 1.0, %v885_v3  ;;  %v703_v43 = vsel %vm699_vm15, 1.0, %v885_v3 }
  0x15   :  { %791 = vmatprep.subr.bf16.mxu0 %v885_v3  ;;  %v100_v46 = vpack.c.bf16 %v703_v43, %v702_v42 }
  0x17   :  { %764 = vmatmul.mubr.msk.bf16.vlgmr.msra.gmra.mrb[0].mxu0 %vm107_vm1, %v101_v18  ;;  %vm963_vm1 = vmpackc.low %vm88_vm13, %vm87_vm12  ;;  %v977_v47 = vand.u32 %v186_v44, %v100_v46  ;;  %v1002_v18 = vsub.s32 0, %v955_v20 }
  0x18   :  { %795 = vmatprep.mubr.msk.bf16.mxu0 %vm886_vm0, %v885_v3  ;;  %768 = vmatpush3.bf16.msk.msra.mxu1 %vm963_vm1, %v889_v45 }
  0x19   :  { %792 = vmatpush3.bf16.msk.msra.mxu0 %vm963_vm1, %v889_v45  ;;  %769 = vmatprep.subr.bf16.mxu1 %v885_v3 }
  0x1a   :  { %793 = vmatprep.subr.bf16.mxu0 %v885_v3 }
  0x1c   :  { %770 = vmatpush3.bf16.msra.mxu1 %v977_v47 }
  0x1d   :  { %794 = vmatpush3.bf16.msra.mxu0 %v977_v47  ;;  %775 = vmatprep.subr.bf16.mxu1 %v885_v3 }
  0x1e   :  { %807 = vmatprep.subr.bf16.mxu0 %v885_v3 }
  0xea   :  { %v983_v48 = vpop.f32.mrb[0].mxu0 }
  0xeb   :  { %v152_v49 = vmul.f32 0.2, %v983_v48  ;;  %v765_v50 = vpop.f32.mrb[1].mxu0 }
  0xec   :  { %v986_v51 = vpop.f32.mrb[2].mxu0 }
  0xed   :  { %v155_v52 = vsel %vm154_vm2, %v152_v49, 0.0  ;;  %v153_v53 = vmul.f32 0.2, %v986_v51  ;;  %v766_v54 = vpop.f32.mrb[3].mxu0 }
  0xee   :  { %v156_v55 = vrot.slane %v155_v52, 4 }
  0xef   :  { %v162_v56 = vsel %vm154_vm2, %v153_v53, 0.0 }
  0xf0   :  { %v157_v57 = vadd.f32 %v156_v55, %v155_v52  ;;  %v163_v58 = vrot.slane %v162_v56, 4 }
  0xf2   :  { %v164_v59 = vadd.f32 %v163_v58, %v162_v56  ;;  %v158_v60 = vrot.slane %v157_v57, 2 }
  0xf4   :  { %v159_v61 = vadd.f32 %v158_v60, %v157_v57  ;;  %v165_v62 = vrot.slane %v164_v59, 2 }
  0xf6   :  { %v160_v63 = vrot.slane %v159_v61, 1  ;;  %v166_v0 = vadd.f32 %v165_v62, %v164_v59 }
  0xf8   :  { %v161_v1 = vadd.f32 %v160_v63, %v159_v61  ;;  %v167_v2 = vrot.slane %v166_v0, 1 }
  0xfa   :  { %v168_v4 = vadd.f32 %v167_v2, %v166_v0  ;;  %v169_v5 = vmul.f32 %v161_v1, %v161_v1 }
  0xfc   :  { %v170_v6 = vmul.f32 %v168_v4, %v168_v4  ;;  %v171_v7 = vpack.c.bf16 %v169_v5, %v169_v5 }
  0xfe   :  { %v172_v8 = vpack.c.bf16 %v170_v6, %v170_v6  ;;  %v175_v9 = vunpack.c.l.b16 %v171_v7 }
 0x100   :  { %v176_v10 = vunpack.c.l.b16 %v172_v8 }
 0x102   :  { %v178_v11 = vsel %vm177_vm3, %v176_v10, %v175_v9 }
 0x103   :  { %v179_v12 = vpack.c.b16 %v178_v11, %v178_v11 }
 0x105   :  { %772 = vmatmul.mubr.msk.bf16.vlgmr.msra.gmra.mrb[0].mxu1 %vm154_vm2, %v179_v12 }
 0x106   :  { %776 = vmatpush3.bf16.msk.msra.mxu1 %vm963_vm1, %v889_v45  ;;  %779 = vmatprep.mubr.msk.bf16.mxu1 %vm886_vm0, %v885_v3 }
 0x107   :  { %777 = vmatprep.subr.bf16.mxu1 %v885_v3 }
 0x10a   :  { %778 = vmatpush3.bf16.msra.mxu1 %v977_v47 }
 0x10b   :  { %783 = vmatprep.subr.bf16.mxu1 %v885_v3 }
 0x1d8   :  { %v224_v13 = vpop.f32.mrb[0].mxu1 }
 0x1d9   :  { %v225_v14 = vadd.f32 1e-07, %v224_v13  ;;  %v773_v15 = vpop.f32.mrb[1].mxu1 }
 0x1da   :  { %v227_v16 = vpop.f32.mrb[2].mxu1 }
 0x1db   :  { %829 = vrsqrt.f32 %v225_v14  ;;  %v774_v17 = vpop.f32.mrb[3].mxu1 }
 0x1e5   :  { %v830_v19 = vpop.eup %829 }
 0x1e6   :  { %v232_v21 = vrot.slane %v830_v19, 1  ;;  %v235_v22 = vmul.f32 %v830_v19, %v161_v1 }
 0x1e8   :  { %v236_v23 = vmul.f32 %v232_v21, %v168_v4  ;;  %v240_v24 = vrot.slane %v235_v22, %v1002_v18 }
 0x1ea   :  { %v244_v25 = vrot.slane %v236_v23, %v1002_v18  ;;  %v245_v26 = vmul.f32 %v240_v24, %v983_v48 }
 0x1ec   :  { %v246_v27 = vmul.f32 %v244_v25, %v986_v51 }
 0x1ee   :  { %v247_v28 = vpack.c.bf16 %v246_v27, %v245_v26 }
 0x1f0   :  { %780 = vmatmul.mubr.msk.bf16.vlgmr.msra.gmra.mrb[4].mxu1 %vm154_vm2, %v247_v28 }
 0x1f1   :  { %784 = vmatpush3.bf16.msk.msra.mxu1 %vm963_vm1, %v889_v45  ;;  %787 = vmatprep.mubr.msk.bf16.mxu1 %vm886_vm0, %v885_v3 }
 0x1f2   :  { %785 = vmatprep.subr.bf16.mxu1 %v885_v3 }
 0x1f5   :  { %786 = vmatpush3.bf16.msra.mxu1 %v977_v47 }
 0x1f6   :  { %799 = vmatprep.subr.bf16.mxu1 %v885_v3 }
 0x2c3   :  { %v285_v20 = vpop.f32.mrb[4].mxu1 }
 0x2c4   :  { %v292_v29 = vmul.f32 1.442695, %v285_v20  ;;  %v781_v30 = vpop.f32.mrb[5].mxu1 }
 0x2c5   :  { %v288_v31 = vpop.f32.mrb[6].mxu1 }
 0x2c6   :  { %831 = vpow2.f32 %v292_v29  ;;  %v294_v32 = vmul.f32 1.442695, %v288_v31  ;;  %v782_v33 = vpop.f32.mrb[7].mxu1 }
 0x2c8   :  { %833 = vpow2.f32 %v294_v32 }
 0x2d0   :  { %v832_v34 = vpop.eup %831 }
 0x2d1   :  { %v296_v35 = vsel %vm154_vm2, %v832_v34, 0.0 }
 0x2d2   :  { %v834_v36 = vpop.eup %833  ;;  %297 = vadd.xlane.f32.xlu0 %v296_v35 }
 0x2d3   :  { %v299_v37 = vsel %vm154_vm2, %v834_v36, 0.0 }
 0x2d6   :  { %300 = vadd.xlane.f32.xlu0 %v299_v37 }
 0x35f   :  { %v298_v38 = vpop.xlane.xlu0 %297 }
 0x360   :  { %835 = vrcp.f32 %v298_v38 }
 0x363   :  { %v301_v39 = vpop.xlane.xlu0 %300 }
 0x364   :  { %837 = vrcp.f32 %v301_v39 }
 0x36a   :  { %v836_v40 = vpop.eup %835 }
 0x36b   :  { %v303_v42 = vmul.f32 5.0, %v836_v40 }
 0x36d   :  { %v306_v43 = vmul.f32 %v832_v34, %v303_v42 }
 0x36e   :  { %v838_v44 = vpop.eup %837 }
 0x36f   :  { %v308_v46 = vmul.f32 %v306_v43, %v983_v48  ;;  %v305_v49 = vmul.f32 5.0, %v838_v44 }
 0x371   :  { %v310_v50 = vsel %vm154_vm2, %v308_v46, 0.0  ;;  %v307_v52 = vmul.f32 %v834_v36, %v305_v49 }
 0x372   :  { %v311_v53 = vrot.slane %v310_v50, 4 }
 0x373   :  { %v309_v54 = vmul.f32 %v307_v52, %v986_v51 }
 0x374   :  { %v312_v55 = vadd.f32 %v311_v53, %v310_v50 }
 0x375   :  { %v317_v56 = vsel %vm154_vm2, %v309_v54, 0.0 }
 0x376   :  { %v313_v57 = vrot.slane %v312_v55, 2  ;;  %v318_v58 = vrot.slane %v317_v56, 4 }
 0x378   :  { %v314_v59 = vadd.f32 %v313_v57, %v312_v55  ;;  %v319_v60 = vadd.f32 %v318_v58, %v317_v56 }
 0x37a   :  { %v315_v61 = vrot.slane %v314_v59, 1  ;;  %v320_v62 = vrot.slane %v319_v60, 2 }
 0x37c   :  { %v316_v63 = vadd.f32 %v315_v61, %v314_v59  ;;  %v321_v0 = vadd.f32 %v320_v62, %v319_v60 }
 0x37e   :  { %v324_v1 = vmul.f32 %v316_v63, %v316_v63  ;;  %v322_v2 = vrot.slane %v321_v0, 1 }
 0x380   :  { %v323_v4 = vadd.f32 %v322_v2, %v321_v0  ;;  %v326_v5 = vpack.c.bf16 %v324_v1, %v324_v1 }
 0x382   :  { %v325_v6 = vmul.f32 %v323_v4, %v323_v4  ;;  %v330_v8 = vunpack.c.l.b16 %v326_v5 }
 0x384   :  { %v327_v7 = vpack.c.bf16 %v325_v6, %v325_v6 }
 0x386   :  { %v331_v9 = vunpack.c.l.b16 %v327_v7 }
 0x388   :  { %v332_v10 = vsel %vm177_vm3, %v331_v9, %v330_v8 }
 0x389   :  { %v333_v11 = vpack.c.b16 %v332_v10, %v332_v10 }
 0x38b   :  { %788 = vmatmul.mubr.msk.bf16.vlgmr.msra.gmra.mrb[8].mxu1 %vm154_vm2, %v333_v11 }
 0x38c   :  { %800 = vmatpush3.bf16.msk.msra.mxu1 %vm963_vm1, %v889_v45  ;;  %803 = vmatprep.mubr.msk.bf16.mxu1 %vm886_vm0, %v885_v3 }
 0x38d   :  { %801 = vmatprep.subr.bf16.mxu1 %v885_v3 }
 0x390   :  { %802 = vmatpush3.bf16.msra.mxu1 %v977_v47 }
 0x391   :  { %815 = vmatprep.subr.bf16.mxu1 %v885_v3 }
 0x45e   :  { %v371_v12 = vpop.f32.mrb[8].mxu1 }
 0x45f   :  { %v372_v13 = vadd.f32 1e-07, %v371_v12  ;;  %v789_v14 = vpop.f32.mrb[9].mxu1 }
 0x460   :  { %v374_v15 = vpop.f32.mrb[10].mxu1 }
 0x461   :  { %839 = vrsqrt.f32 %v372_v13  ;;  %v790_v16 = vpop.f32.mrb[11].mxu1 }
 0x46b   :  { %v840_v17 = vpop.eup %839 }
 0x46c   :  { %v379_v19 = vrot.slane %v840_v17, 1  ;;  %v382_v21 = vmul.f32 %v840_v17, %v316_v63 }
 0x46e   :  { %v383_v22 = vmul.f32 %v379_v19, %v323_v4  ;;  %v387_v23 = vrot.slane %v382_v21, %v1002_v18 }
 0x470   :  { %v391_v24 = vrot.slane %v383_v22, %v1002_v18  ;;  %v392_v25 = vmul.f32 %v387_v23, %v983_v48 }
 0x472   :  { %v393_v26 = vmul.f32 %v391_v24, %v986_v51 }
 0x474   :  { %v394_v27 = vpack.c.bf16 %v393_v26, %v392_v25 }
 0x476   :  { %796 = vmatmul.mubr.msk.bf16.vlgmr.msra.gmra.mrb[4].mxu0 %vm154_vm2, %v394_v27 }
 0x477   :  { %808 = vmatpush3.bf16.msk.msra.mxu0 %vm963_vm1, %v889_v45  ;;  %811 = vmatprep.mubr.msk.bf16.mxu0 %vm886_vm0, %v885_v3 }
 0x478   :  { %809 = vmatprep.subr.bf16.mxu0 %v885_v3 }
 0x47b   :  { %810 = vmatpush3.bf16.msra.mxu0 %v977_v47 }
 0x549   :  { %v432_v28 = vpop.f32.mrb[4].mxu0 }
 0x54a   :  { %v439_v20 = vmul.f32 1.442695, %v432_v28  ;;  %v797_v29 = vpop.f32.mrb[5].mxu0 }
 0x54b   :  { %v435_v30 = vpop.f32.mrb[6].mxu0 }
 0x54c   :  { %841 = vpow2.f32 %v439_v20  ;;  %v441_v31 = vmul.f32 1.442695, %v435_v30  ;;  %v798_v32 = vpop.f32.mrb[7].mxu0 }
 0x54e   :  { %843 = vpow2.f32 %v441_v31 }
 0x556   :  { %v842_v33 = vpop.eup %841 }
 0x557   :  { %v443_v34 = vsel %vm154_vm2, %v842_v33, 0.0 }
 0x558   :  { %v844_v35 = vpop.eup %843  ;;  %444 = vadd.xlane.f32.xlu1 %v443_v34 }
 0x559   :  { %v446_v36 = vsel %vm154_vm2, %v844_v35, 0.0 }
 0x55c   :  { %447 = vadd.xlane.f32.xlu1 %v446_v36 }
 0x5e5   :  { %v445_v37 = vpop.xlane.xlu1 %444 }
 0x5e6   :  { %845 = vrcp.f32 %v445_v37 }
 0x5e9   :  { %v448_v38 = vpop.xlane.xlu1 %447 }
 0x5ea   :  { %847 = vrcp.f32 %v448_v38 }
 0x5f0   :  { %v846_v39 = vpop.eup %845 }
 0x5f1   :  { %v450_v40 = vmul.f32 5.0, %v846_v39 }
 0x5f3   :  { %v453_v42 = vmul.f32 %v842_v33, %v450_v40 }
 0x5f4   :  { %v848_v43 = vpop.eup %847 }
 0x5f5   :  { %v455_v44 = vmul.f32 %v453_v42, %v983_v48  ;;  %v452_v46 = vmul.f32 5.0, %v848_v43 }
 0x5f7   :  { %v457_v49 = vsel %vm154_vm2, %v455_v44, 0.0  ;;  %v454_v50 = vmul.f32 %v844_v35, %v452_v46 }
 0x5f8   :  { %v458_v52 = vrot.slane %v457_v49, 4 }
 0x5f9   :  { %v456_v53 = vmul.f32 %v454_v50, %v986_v51 }
 0x5fa   :  { %v459_v54 = vadd.f32 %v458_v52, %v457_v49 }
 0x5fb   :  { %v464_v55 = vsel %vm154_vm2, %v456_v53, 0.0 }
 0x5fc   :  { %v460_v56 = vrot.slane %v459_v54, 2  ;;  %v465_v57 = vrot.slane %v464_v55, 4 }
 0x5fe   :  { %v461_v58 = vadd.f32 %v460_v56, %v459_v54  ;;  %v466_v59 = vadd.f32 %v465_v57, %v464_v55 }
 0x600   :  { %v462_v60 = vrot.slane %v461_v58, 1  ;;  %v467_v61 = vrot.slane %v466_v59, 2 }
 0x602   :  { %v463_v62 = vadd.f32 %v462_v60, %v461_v58  ;;  %v468_v63 = vadd.f32 %v467_v61, %v466_v59 }
 0x604   :  { %v471_v0 = vmul.f32 %v463_v62, %v463_v62  ;;  %v469_v1 = vrot.slane %v468_v63, 1 }
 0x606   :  { %v470_v2 = vadd.f32 %v469_v1, %v468_v63  ;;  %v473_v4 = vpack.c.bf16 %v471_v0, %v471_v0 }
 0x608   :  { %v472_v5 = vmul.f32 %v470_v2, %v470_v2  ;;  %v477_v7 = vunpack.c.l.b16 %v473_v4 }
 0x60a   :  { %v474_v6 = vpack.c.bf16 %v472_v5, %v472_v5 }
 0x60c   :  { %v478_v8 = vunpack.c.l.b16 %v474_v6 }
 0x60e   :  { %v479_v9 = vsel %vm177_vm3, %v478_v8, %v477_v7 }
 0x60f   :  { %v480_v10 = vpack.c.b16 %v479_v9, %v479_v9 }
 0x611   :  { %804 = vmatmul.mubr.msk.bf16.vlgmr.msra.gmra.mrb[12].mxu1 %vm154_vm2, %v480_v10 }
 0x612   :  { %816 = vmatpush3.bf16.msk.msra.mxu1 %vm963_vm1, %v889_v45  ;;  %819 = vmatprep.mubr.msk.bf16.mxu1 %vm886_vm0, %v885_v3  ;;  %vm683_vm0 = vcmask 197632  }
 0x613   :  { %817 = vmatprep.subr.bf16.mxu1 %v885_v3 }
 0x616   :  { %818 = vmatpush3.bf16.msra.mxu1 %v977_v47 }
 0x6e4   :  { %v518_v11 = vpop.f32.mrb[12].mxu1 }
 0x6e5   :  { %v519_v12 = vadd.f32 1e-07, %v518_v11  ;;  %v805_v13 = vpop.f32.mrb[13].mxu1 }
 0x6e6   :  { %v521_v14 = vpop.f32.mrb[14].mxu1 }
 0x6e7   :  { %849 = vrsqrt.f32 %v519_v12  ;;  %v806_v15 = vpop.f32.mrb[15].mxu1 }
 0x6f1   :  { %v850_v16 = vpop.eup %849 }
 0x6f2   :  { %v526_v17 = vrot.slane %v850_v16, 1  ;;  %v529_v19 = vmul.f32 %v850_v16, %v463_v62 }
 0x6f4   :  { %v530_v21 = vmul.f32 %v526_v17, %v470_v2  ;;  %v534_v41 = vrot.slane %v529_v19, %v1002_v18 }
 0x6f6   :  { %v538_v45 = vrot.slane %v530_v21, %v1002_v18  ;;  %v539_v22 = vmul.f32 %v534_v41, %v983_v48 }
 0x6f8   :  { %v540_v3 = vmul.f32 %v538_v45, %v986_v51 }
 0x6fa   :  { %v541_v23 = vpack.c.bf16 %v540_v3, %v539_v22 }
 0x6fc   :  { %812 = vmatmul.mubr.msk.bf16.vlgmr.msra.gmra.mrb[8].mxu0 %vm154_vm2, %v541_v23 }
 0x7cf   :  { %v579_v47 = vpop.f32.mrb[8].mxu0 }
 0x7d0   :  { %v586_v24 = vmul.f32 1.442695, %v579_v47  ;;  %v813_v25 = vpop.f32.mrb[9].mxu0 }
 0x7d1   :  { %v582_v26 = vpop.f32.mrb[10].mxu0 }
 0x7d2   :  { %851 = vpow2.f32 %v586_v24  ;;  %v588_v27 = vmul.f32 1.442695, %v582_v26  ;;  %v814_v28 = vpop.f32.mrb[11].mxu0 }
 0x7d4   :  { %853 = vpow2.f32 %v588_v27 }
 0x7dc   :  { %v852_v20 = vpop.eup %851 }
 0x7dd   :  { %v590_v29 = vsel %vm154_vm2, %v852_v20, 0.0 }
 0x7de   :  { %v854_v30 = vpop.eup %853  ;;  %591 = vadd.xlane.f32.xlu0 %v590_v29 }
 0x7df   :  { %v593_v18 = vsel %vm154_vm2, %v854_v30, 0.0 }
 0x7e0   :  { %594 = vadd.xlane.f32.xlu1 %v593_v18 }
 0x86b   :  { %v592_v31 = vpop.xlane.xlu0 %591 }
 0x86c   :  { %855 = vrcp.f32 %v592_v31 }
 0x86d   :  { %v595_v32 = vpop.xlane.xlu1 %594 }
 0x86e   :  { %857 = vrcp.f32 %v595_v32 }
 0x876   :  { %v856_v33 = vpop.eup %855 }
 0x877   :  { %v597_v34 = vmul.f32 5.0, %v856_v33 }
 0x878   :  { %v858_v35 = vpop.eup %857 }
 0x879   :  { %v600_v36 = vmul.f32 %v852_v20, %v597_v34  ;;  %v599_v37 = vmul.f32 5.0, %v858_v35 }
 0x87b   :  { %v602_v38 = vmul.f32 %v600_v36, %v983_v48  ;;  %v601_v39 = vmul.f32 %v854_v30, %v599_v37 }
 0x87d   :  { %v604_v40 = vsel %vm154_vm2, %v602_v38, 0.0  ;;  %v603_v42 = vmul.f32 %v601_v39, %v986_v51 }
 0x87e   :  { %v605_v43 = vrot.slane %v604_v40, 4 }
 0x87f   :  { %v611_v44 = vsel %vm154_vm2, %v603_v42, 0.0 }
 0x880   :  { %v606_v46 = vadd.f32 %v605_v43, %v604_v40  ;;  %v612_v49 = vrot.slane %v611_v44, 4 }
 0x882   :  { %v607_v50 = vrot.slane %v606_v46, 2  ;;  %v613_v52 = vadd.f32 %v612_v49, %v611_v44 }
 0x884   :  { %v608_v53 = vadd.f32 %v607_v50, %v606_v46  ;;  %v614_v54 = vrot.slane %v613_v52, 2 }
 0x886   :  { %v609_v55 = vrot.slane %v608_v53, 1  ;;  %v615_v56 = vadd.f32 %v614_v54, %v613_v52 }
 0x888   :  { %v610_v57 = vadd.f32 %v609_v55, %v608_v53  ;;  %v616_v58 = vrot.slane %v615_v56, 1 }
 0x88a   :  { %v618_v59 = vmul.f32 %v610_v57, %v610_v57  ;;  %v617_v48 = vadd.f32 %v616_v58, %v615_v56 }
 0x88c   :  { %v620_v60 = vpack.c.bf16 %v618_v59, %v618_v59  ;;  %v619_v61 = vmul.f32 %v617_v48, %v617_v48 }
 0x88e   :  { %v621_v62 = vpack.c.bf16 %v619_v61, %v619_v61  ;;  %v624_v63 = vunpack.c.l.b16 %v620_v60 }
 0x890   :  { %v625_v51 = vunpack.c.l.b16 %v621_v62 }
 0x892   :  { %v626_v0 = vsel %vm177_vm3, %v625_v51, %v624_v63 }
 0x893   :  { %v627_v1 = vpack.c.b16 %v626_v0, %v626_v0 }
 0x895   :  { %820 = vmatmul.mubr.msk.bf16.vlgmr.msra.gmra.mrb[16].mxu1 %vm154_vm2, %v627_v1 }
 0x968   :  { %v665_v2 = vpop.f32.mrb[16].mxu1 }
 0x969   :  { %v666_v4 = vadd.f32 1e-07, %v665_v2  ;;  %v821_v5 = vpop.f32.mrb[17].mxu1 }
 0x96a   :  { %v668_v6 = vpop.f32.mrb[18].mxu1 }
 0x96b   :  { %859 = vrsqrt.f32 %v666_v4  ;;  %v822_v7 = vpop.f32.mrb[19].mxu1 }
 0x975   :  { %v860_v8 = vpop.eup %859 }
 0x976   :  { %v673_v9 = vrot.slane %v860_v8, 1  ;;  %v676_v11 = vmul.f32 %v860_v8, %v610_v57 }
 0x978   :  { %v677_v10 = vmul.f32 %v673_v9, %v617_v48 }
 0x97a   :  { %v680_v12 = vrot.slane %v677_v10, 7 }
 0x97c   :  { %v681_v13 = vsel %vm177_vm3, %v680_v12, %v676_v11 }
 0x97d   :  { %684 = vst.msk [vmem:[#allocation2] sm:$0x3] %vm683_vm0, %v681_v13 }
 0x97e   :  { %872 = shalt.err (!%p869_p4)
}
 0x97f   :  { %s873_s8 = scalar_lea.hbm %s1088_s2, 32 }
 0x980   :  { %p874_p5 = scmp.ne.s32.totalorder %s1088_s2, %s873_s8  ;;  %p877_p6 = scmp.lt.u32.totalorder %s873_s8, %s1088_s2 }
 0x982   :  { %p879_p7 = pnand %p877_p6, %p874_p5 }
 0x984   :  { %882 = shalt.err (!%p879_p7)
}
 0x985   :  { %694 = dma.vmem_to_hbm [thread:$0]  %s692_s1, 32, %s1088_s2, [#allocation3]  }
 0x986   :  { %883 = dma.done.wait [#allocation3], 32  }
 0x987   :  { %884 = vsyncadd [#allocation3], 4294967264 }
 0x988   :  { %698 = vsyncpa [#allocation3], 1 }

</bundles_post_ra>
